<compile_context>
chip_gen: v7x
topology: tpu7x:2x2x1
jax: 0.10.0
libtpu: 0.0.40
codegen_flags: <defaults>
</compile_context>

<pallas_src>
import jax
import jax.numpy as jnp
from jax.experimental import pallas as pl
from jax.experimental.pallas import tpu as pltpu

LR = 1e-2  # model_optimizer modeled as SGD(lr=LR)


def _round_up(x: int, m: int) -> int:
    return ((x + m - 1) // m) * m


def _pad_reshape(flat, rows_pad: int, lanes: int):
    total = rows_pad * lanes
    if total != flat.shape[0]:
        flat = jnp.pad(flat, (0, total - flat.shape[0]))
    return flat.reshape(rows_pad, lanes)


# ------------------------------------------------------------------
# Fused kernel.  Per (block_rows, lanes) tile:
#   theta_new = theta_t - LR * (alpha * grad_bucket)      (premul + SGD step)
#   dot_acc  += sum(new_grads * grad_bucket, axis=0)      (alpha-grad partial)
# dot_ref is a resident (1, lanes) accumulator (same block for every grid
# step), initialized at step 0 and written back once at the end.
# ------------------------------------------------------------------
def fused_step_kernel(alpha_ref, theta_ref, grad_ref, newg_ref,
                      theta_out_ref, dot_ref):
    @pl.when(pl.program_id(0) == 0)
    def _():
        dot_ref[...] = jnp.zeros_like(dot_ref)

    coef = alpha_ref[0, 0]                                   # scalar alpha (SMEM)
    g = grad_ref[...].astype(jnp.float32)
    theta_out_ref[...] = (theta_ref[...].astype(jnp.float32)
                          - (LR * coef) * g).astype(theta_out_ref.dtype)
    dot_ref[...] += jnp.sum(newg_ref[...].astype(jnp.float32) * g,
                            axis=0, keepdims=True)


# Finalize path: premul + SGD only (no new grads, no alpha gradient).
def premul_sgd_kernel(alpha_ref, theta_ref, grad_ref, theta_out_ref):
    coef = alpha_ref[0, 0]
    theta_out_ref[...] = (theta_ref[...].astype(jnp.float32)
                          - (LR * coef) * grad_ref[...].astype(jnp.float32)
                          ).astype(theta_out_ref.dtype)


def _tiling(num_params: int, lanes: int, block_rows: int):
    assert lanes % 128 == 0, "lane axis must be a multiple of 128"
    rows = pl.cdiv(num_params, lanes)
    # Shrink the block for tiny inputs; keep the sublane axis a multiple of 16
    # (safe for both f32 and bf16 min-tiles).
    block_rows = _round_up(min(block_rows, _round_up(rows, 16)), 16)
    rows_pad = _round_up(rows, block_rows)
    num_blocks = rows_pad // block_rows
    return rows_pad, block_rows, num_blocks


def _vmem_limit(block_rows: int, lanes: int, n_streams: int, itemsize: int) -> int:
    # double-buffered tiles for every streamed array + small slack
    need = 2 * n_streams * block_rows * lanes * itemsize + (2 << 20)
    return int(min(max(need, 16 << 20), 32 << 20))  # fits v5e/v6e/v7x scoped VMEM


# ------------------------------------------------------------------
# AlphaModel.forward equivalent (single device: premul-sum == premul).
# ------------------------------------------------------------------
def alpha_model_forward(alpha, theta_t, grad_bucket, new_grads=None, *,
                        finalize=False, lanes=512, block_rows=512):
    """Returns (updated_params, alpha_grad or None)."""
    orig_shape = theta_t.shape
    theta_flat = theta_t.reshape(-1)
    grad_flat = grad_bucket.reshape(-1)
    num_params = theta_flat.shape[0]

    rows_pad, block_rows, num_blocks = _tiling(num_params, lanes, block_rows)
    itemsize = jnp.dtype(theta_t.dtype).itemsize

    alpha2d = jnp.asarray(alpha, dtype=jnp.float32).reshape(1, 1)
    theta2d = _pad_reshape(theta_flat, rows_pad, lanes)
    grad2d = _pad_reshape(grad_flat, rows_pad, lanes)

    tile_spec = pl.BlockSpec((block_rows, lanes), lambda i: (i, 0))
    alpha_spec = pl.BlockSpec(memory_space=pltpu.MemorySpace.SMEM)

    if finalize:
        theta_new2d = pl.pallas_call(
            premul_sgd_kernel,
            out_shape=jax.ShapeDtypeStruct((rows_pad, lanes), theta2d.dtype),
            grid=(num_blocks,),
            in_specs=[alpha_spec, tile_spec, tile_spec],
            out_specs=tile_spec,
            input_output_aliases={1: 0},                      # theta updated in place
            compiler_params=pltpu.CompilerParams(
                dimension_semantics=("arbitrary",),
                vmem_limit_bytes=_vmem_limit(block_rows, lanes, 3, itemsize)),
        )(alpha2d, theta2d, grad2d)
        theta_new = theta_new2d.reshape(-1)[:num_params].reshape(orig_shape)
        return theta_new, None

    assert new_grads is not None, "new_grads required unless finalize=True"
    newg2d = _pad_reshape(new_grads.reshape(-1), rows_pad, lanes)

    theta_new2d, dot_row = pl.pallas_call(
        fused_step_kernel,
        out_shape=(jax.ShapeDtypeStruct((rows_pad, lanes), theta2d.dtype),
                   jax.ShapeDtypeStruct((1, lanes), jnp.float32)),
        grid=(num_blocks,),
        in_specs=[alpha_spec, tile_spec, tile_spec, tile_spec],
        out_specs=(tile_spec,
                   pl.BlockSpec((1, lanes), lambda i: (0, 0))),  # resident accumulator
        input_output_aliases={1: 0},                             # theta updated in place
        compiler_params=pltpu.CompilerParams(
            dimension_semantics=("arbitrary",),                  # reduction across grid
            vmem_limit_bytes=_vmem_limit(block_rows, lanes, 4, itemsize)),
    )(alpha2d, theta2d, grad2d, newg2d)

    theta_new = theta_new2d.reshape(-1)[:num_params].reshape(orig_shape)
    # Trivial combine of the lane-wise partial sums (just `lanes` floats).
    alpha_grad = -jnp.sum(dot_row)
    return theta_new, alpha_grad


if __name__ == "__main__":
    key = jax.random.PRNGKey(0)
    k1, k2, k3 = jax.random.split(key, 3)

    # Small synthetic flattened "model": deliberately NOT a multiple of the tile
    # so the padding / ragged-tail path is exercised.
    P = 33_000
    initial_alpha = 0.5
    alpha = jnp.float32(initial_alpha)                       # nn.Parameter(alpha)

    theta_t = jax.random.normal(k1, (P,), dtype=jnp.float32)      # model_at_t params
    grad_bucket = jax.random.normal(k2, (P,), dtype=jnp.float32)  # stored grads
    new_grads = jax.random.normal(k3, (P,), dtype=jnp.float32)    # grads after fwd/bwd

    ref_theta = theta_t - LR * (initial_alpha * grad_bucket)
    ref_alpha_grad = -jnp.dot(new_grads, grad_bucket)

    # Small tiles here so the tiny test still spans several grid steps + a tail.
    theta_new, alpha_grad = alpha_model_forward(
        alpha, theta_t, grad_bucket, new_grads, lanes=256, block_rows=64)
    jax.block_until_ready((theta_new, alpha_grad))
    assert theta_new.shape == theta_t.shape
    assert jnp.allclose(theta_new, ref_theta, atol=1e-5, rtol=1e-5)
    assert jnp.allclose(alpha_grad, ref_alpha_grad, atol=1e-2, rtol=1e-3)

    # Finalize path (premul + step only, no alpha gradient).
    theta_fin, none_grad = alpha_model_forward(
        alpha, theta_t, grad_bucket, finalize=True, lanes=256, block_rows=64)
    jax.block_until_ready(theta_fin)
    assert none_grad is None
    assert jnp.allclose(theta_fin, ref_theta, atol=1e-5, rtol=1e-5)

    # Production (large-tile) default path.
    theta_big, alpha_grad_big = alpha_model_forward(alpha, theta_t, grad_bucket, new_grads)
    jax.block_until_ready((theta_big, alpha_grad_big))
    assert jnp.allclose(theta_big, ref_theta, atol=1e-5, rtol=1e-5)
    assert jnp.allclose(alpha_grad_big, ref_alpha_grad, atol=1e-2, rtol=1e-3)

    print("KERNEL_OK")
</pallas_src>

<mosaic_0001>
module attributes {stable_mosaic.version = 11 : i64} {
  func.func @fused_step_kernel(%arg0: i32, %arg1: memref<1x1xf32, #tpu.memory_space<smem>>, %arg2: memref<64x256xf32, #tpu.memory_space<vmem>>, %arg3: memref<64x256xf32, #tpu.memory_space<vmem>>, %arg4: memref<64x256xf32, #tpu.memory_space<vmem>>, %arg5: memref<64x256xf32, #tpu.memory_space<vmem>>, %arg6: memref<1x256xf32, #tpu.memory_space<vmem>>) attributes {dimension_semantics = [#tpu.dimension_semantics<arbitrary>], iteration_bounds = array<i64: 3>, scalar_prefetch = 0 : i64, scratch_operands = 0 : i64, tpu.core_type = #tpu.core_type<tc>, window_params = [{transform_indices = @transform_0, window_bounds = array<i64: 1, 1>}, {transform_indices = @transform_1, window_bounds = array<i64: 64, 256>}, {transform_indices = @transform_2, window_bounds = array<i64: 64, 256>}, {transform_indices = @transform_3, window_bounds = array<i64: 64, 256>}, {transform_indices = @transform_4, window_bounds = array<i64: 64, 256>}, {pipeline_mode = #tpu.pipeline_mode<synchronous>, transform_indices = @transform_5, window_bounds = array<i64: 1, 256>}]} {
    %c0_i32 = arith.constant 0 : i32
    %0 = arith.cmpi eq, %arg0, %c0_i32 : i32
    %1 = arith.extui %0 : i1 to i32
    %c0_i32_0 = arith.constant 0 : i32
    %2 = arith.cmpi ne, %1, %c0_i32_0 : i32
    scf.if %2 {
      %cst_15 = arith.constant 0.000000e+00 : f32
      %18 = vector.broadcast %cst_15 : f32 to vector<1x256xf32>
      %c0_16 = arith.constant 0 : index
      %c0_17 = arith.constant 0 : index
      %19 = vector.load %arg6[%c0_16, %c0_17] : memref<1x256xf32, #tpu.memory_space<vmem>>, vector<1x256xf32>
      tpu.vector_store %arg6[%c0_16, %c0_17], %18 {strides = array<i32>} : memref<1x256xf32, #tpu.memory_space<vmem>>, vector<1x256xf32>,
    } else {
    }
    %c0 = arith.constant 0 : index
    %c0_1 = arith.constant 0 : index
    %3 = memref.load %arg1[%c0, %c0_1] : memref<1x1xf32, #tpu.memory_space<smem>>
    %c0_2 = arith.constant 0 : index
    %c0_3 = arith.constant 0 : index
    %4 = vector.load %arg3[%c0_2, %c0_3] : memref<64x256xf32, #tpu.memory_space<vmem>>, vector<64x256xf32>
    %c0_4 = arith.constant 0 : index
    %c0_5 = arith.constant 0 : index
    %5 = vector.load %arg2[%c0_4, %c0_5] : memref<64x256xf32, #tpu.memory_space<vmem>>, vector<64x256xf32>
    %cst = arith.constant 0.00999999977 : f32
    %6 = arith.mulf %cst, %3 : f32
    %7 = vector.broadcast %6 : f32 to vector<64x256xf32>
    %8 = arith.mulf %7, %4 : vector<64x256xf32>
    %9 = arith.subf %5, %8 : vector<64x256xf32>
    %c0_6 = arith.constant 0 : index
    %c0_7 = arith.constant 0 : index
    %10 = vector.load %arg5[%c0_6, %c0_7] : memref<64x256xf32, #tpu.memory_space<vmem>>, vector<64x256xf32>
    tpu.vector_store %arg5[%c0_6, %c0_7], %9 {strides = array<i32>} : memref<64x256xf32, #tpu.memory_space<vmem>>, vector<64x256xf32>,
    %c0_8 = arith.constant 0 : index
    %c0_9 = arith.constant 0 : index
    %11 = vector.load %arg6[%c0_8, %c0_9] : memref<1x256xf32, #tpu.memory_space<vmem>>, vector<1x256xf32>
    %c0_10 = arith.constant 0 : index
    %c0_11 = arith.constant 0 : index
    %12 = vector.load %arg4[%c0_10, %c0_11] : memref<64x256xf32, #tpu.memory_space<vmem>>, vector<64x256xf32>
    %13 = arith.mulf %12, %4 : vector<64x256xf32>
    %cst_12 = arith.constant dense<0.000000e+00> : vector<256xf32>
    %14 = vector.multi_reduction <add>, %13, %cst_12 [0] : vector<64x256xf32> to vector<256xf32>
    %15 = vector.shape_cast %14 : vector<256xf32> to vector<1x256xf32>
    %16 = arith.addf %11, %15 : vector<1x256xf32>
    %c0_13 = arith.constant 0 : index
    %c0_14 = arith.constant 0 : index
    %17 = vector.load %arg6[%c0_13, %c0_14] : memref<1x256xf32, #tpu.memory_space<vmem>>, vector<1x256xf32>
    tpu.vector_store %arg6[%c0_13, %c0_14], %16 {strides = array<i32>} : memref<1x256xf32, #tpu.memory_space<vmem>>, vector<1x256xf32>,
    return
  }
  func.func @transform_0(%arg0: i32) -> (i32, i32) {
    %c0_i32 = arith.constant 0 : i32
    %c0_i32_0 = arith.constant 0 : i32
    %c0_i32_1 = arith.constant 0 : i32
    return %c0_i32, %c0_i32_0 : i32, i32
  }
  func.func @transform_1(%arg0: i32) -> (i32, i32) {
    %c0_i32 = arith.constant 0 : i32
    %c0_i32_0 = arith.constant 0 : i32
    return %arg0, %c0_i32 : i32, i32
  }
  func.func @transform_2(%arg0: i32) -> (i32, i32) {
    %c0_i32 = arith.constant 0 : i32
    %c0_i32_0 = arith.constant 0 : i32
    return %arg0, %c0_i32 : i32, i32
  }
  func.func @transform_3(%arg0: i32) -> (i32, i32) {
    %c0_i32 = arith.constant 0 : i32
    %c0_i32_0 = arith.constant 0 : i32
    return %arg0, %c0_i32 : i32, i32
  }
  func.func @transform_4(%arg0: i32) -> (i32, i32) {
    %c0_i32 = arith.constant 0 : i32
    %c0_i32_0 = arith.constant 0 : i32
    return %arg0, %c0_i32 : i32, i32
  }
  func.func @transform_5(%arg0: i32) -> (i32, i32) {
    %c0_i32 = arith.constant 0 : i32
    %c0_i32_0 = arith.constant 0 : i32
    %c0_i32_1 = arith.constant 0 : i32
    return %c0_i32, %c0_i32_0 : i32, i32
  }
}

</mosaic_0001>

<bundles_post_ra>
// kernel: tpu_custom_call.1
= control target key start
LH: loop header
LB: loop body
LE: loop exit
PB: predicated region body
PF: predicated region fallthrough
CT: control target
= control target key end

     0   :  { %s1151_s0 = inlined_call_operand.<no memory space> [shape: f32[1,1], index: 0, kind: input, shape index: {}]   ;;  %s1152_s1 = inlined_call_operand.hbm [shape: f32[192,256], index: 1, kind: input, shape index: {}, may-alias: {1,4}]   ;;  %s1153_s2 = inlined_call_operand.vmem [shape: f32[192,256], index: 2, kind: input, shape index: {}]   ;;  %s1154_s3 = inlined_call_operand.vmem [shape: f32[192,256], index: 3, kind: input, shape index: {}]   ;;  %s1155_s4 = inlined_call_operand.hbm [shape: f32[192,256], index: 4, kind: output, shape index: {0}, may-alias: {1,4}]   ;;  %s1156_s5 = inlined_call_operand.hbm [shape: f32[1,256], index: 5, kind: output, shape index: {1}]  }
   0x1   :  { %11 = sst [smem:[#allocation2]] %s1151_s0 }
   0x2   :  { %12 = vsyncpa [#allocation4], 0 }
   0x3   :  { %14 = vsyncpa [#allocation4 + $0x1], 0 }
   0x4   :  { %15 = vsyncpa [#allocation5], 0 }
   0x5   :  { %17 = vsyncpa [#allocation5 + $0x1], 0 }
   0x6   :  { %18 = vsyncpa [#allocation8], 0  ;;  %s865_s20 = smov 0   ;;  %s867_s21 = smov 0  }
   0x7   :  { %s869_s22 = smov 0   ;;  %s871_s23 = smov 0  }
   0x8 LB: > { %s886_s0 = sadd.s32 4294967295, %s821_s23   ;;  %s605_s24 = sadd.s32 4294967294, %s821_s23   ;;  %s821_s23 = sphi %s871_s23, %s1174_s23   ;;  %s817_s22 = sphi %s869_s22, %s1173_s22   ;;  %s813_s21 = sphi %s867_s21, %s1172_s21   ;;  %s809_s20 = sphi %s865_s20, %s1171_s20  }
   0x9   : > { %s890_s25 = sadd.s32 1, %s821_s23   ;;  %s52_s26 = sadd.s32 1, %s817_s22 }
   0xa   : > { %s49_s27 = ssub.s32 %s821_s23, %s890_s25  ;;  %p59_p0 = scmp.ne.s32.totalorder %s817_s22, %s813_s21 }
   0xb   : > { %p50_p1 = scmp.eq.s32.totalorder %s49_s27, 0  ;;  %p60_p2 = scmp.eq.s32.totalorder %s821_s23, 0 }
   0xc   : > { %p65_p3 = scmp.ne.s32.totalorder %s813_s21, %s809_s20  ;;  %p66_p4 = scmp.eq.s32.totalorder %s886_s0, 0 }
   0xd   : > { %s902_s28 = scalar_select %p50_p1, %s817_s22, %s52_s26  }
   0xe   : > { %p904_p5 = por %p60_p2, %p59_p0  ;;  %p908_p6 = por %p66_p4, %p65_p3 }
   0xf   : > { %p1157_p7 = scmp.eq.s32.totalorder %s886_s0, 2  ;;  %p147_p8 = scmp.eq.s32.totalorder %s605_s24, 2 }
  0x10   : > { %p652_p9 = scmp.lt.s32.totalorder %s821_s23, 3  ;;  %s191_s8 = sand.u32 1, %s817_s22  }
  0x11   : > { %p916_p10 = por %p1157_p7, %p59_p0  ;;  %p920_p11 = por %p147_p8, %p65_p3 }
  0x12   : > { %s631_s9 = sshll.u32 %s821_s23, 11  ;;  %s608_s10 = sshll.u32 %s191_s8, 7 }
  0x13   : > { %s1161_s6 = scalar_select %p916_p10, 1, 0 }
  0x14   : > { %s1162_s7 = scalar_select %p920_p11, 1, 0 }
  0x15   : > { %s929_s13 = scalar_lea.hbm %s1152_s1, %s631_s9  ;;  %s195_s14 = scalar_lea.vmem [#allocation3], %s608_s10 }
  0x16   : > { %s203_s15 = sshll.u32 %s195_s14, 4  ;;  %p933_p12 = pnand %p652_p9, %p904_p5  ;;  %s937_s15 = int_to_ptr.vmem [resolvable:$true] %s203_s15 }
  0x17   : > { %s939_s17 = scalar_lea.sflag [#allocation4], %s191_s8  ;;  %s695_s18 = scalar_lea.hbm %s929_s13, 2048 }
  0x18   : > { %p696_p13 = scmp.ne.s32.totalorder %s929_s13, %s695_s18  ;;  %p697_p0 = pneg %p933_p12 }
  0x19   : > { %s700_s26 = scalar_lea.hbm %s1152_s1, 6144  ;;  %p701_p3 = scmp.lt.u32.totalorder %s929_s13, %s1152_s1 }
  0x1a   : > { %p698_p1 = pnand %p697_p0, %p696_p13  ;;  %p702_p4 = scmp.lt.u32.totalorder %s700_s26, %s695_s18 }
  0x1b   : > { %p704_p8 = scmp.lt.u32.totalorder %s695_s18, %s929_s13 }
  0x1c   : > { %p699_p2 = pneg %p698_p1  ;;  %p703_p5 = por %p702_p4, %p701_p3 }
  0x1e   : > { %p705_p9 = por %p704_p8, %p703_p5 }
  0x20   : > { %p706_p7 = pnand %p705_p9, %p699_p2 }
  0x22   : > { %709 = shalt.err (!%p706_p7)
}
  0x23   : > { %s710_s8 = scalar_lea.vmem %s937_s15, 2048  ;;  %s823_s9 = smov [#allocation3]  }
  0x24   : > { %p711_p13 = scmp.ne.s32.totalorder %s937_s15, %s710_s8  ;;  %s715_s10 = sshll.u32 %s823_s9, 4  ;;  %s716_s10 = int_to_ptr.vmem [resolvable:$false] %s715_s10 }
  0x25   : > { %s717_s11 = scalar_lea.vmem %s716_s10, 4096  ;;  %p718_p10 = scmp.lt.s32.totalorder %s937_s15, %s716_s10 }
  0x26   : > { %p713_p1 = pnand %p711_p13, %p697_p0  ;;  %p719_p3 = scmp.lt.s32.totalorder %s717_s11, %s710_s8 }
  0x28   : > { %p714_p11 = pneg %p713_p1  ;;  %p720_p4 = por %p719_p3, %p718_p10 }
  0x2a   : > { %p721_p5 = pnand %p720_p4, %p714_p11 }
  0x2c   : > { %724 = shalt.err (!%p721_p5)
}
  0x2d   : > { %s824_s12 = smov 256   ;;  %s825_s14 = smov 16  }
  0x2e   : > { %647 = dma.hbm_to_vmem [thread:$0]  (!%p933_p12), %s929_s13, 2048, %s937_s15, %s939_s17, %s824_s12, %s824_s12, %s825_s14  }
  0x2f   : > { %p612_p7 = scmp.ge.s32.totalorder %s821_s23, 1  ;;  %p231_p0 = scmp.lt.s32.totalorder %s821_s23, 4 }
  0x31   : > { %p232_p2 = pnand %p612_p7, %p231_p0 }
  0x32   : > { %s970_s18 = sand.u32 (!%p232_p2), 1, %s813_s21  }
  0x33   : > { %235 = sbr.rel (%p232_p2) target bundleno = 143 (0x8f), region = 36  ;;  %s613_s19 = sshll.u32 (!%p232_p2), %s970_s18, 7 }
  0x34   : > { %s238_s24 = scalar_lea.sflag (!%p232_p2), [#allocation4], %s970_s18  ;;  %s974_s26 = scalar_lea.vmem (!%p232_p2), [#allocation3], %s613_s19 }
  0x3a   : > { %796 = dma.done.wait (%p908_p6), %s238_s24, 2048  }
  0x3b   : > { %798 = vsyncadd (%p908_p6), %s238_s24, 4294965248  ;;  %s615_s13 = sshll.u32 %s886_s0, 3  ;;  %s991_s10 = scalar_lea.vmem [#allocation6], %s613_s19 }
  0x3c   : > { %p282_p10 = scmp.lt.s32.totalorder %s615_s13, 23  ;;  %p621_p11 = scmp.ne.s32.totalorder %s886_s0, 0 }
  0x3d   : > { %v300_v0 = vlaneseq (!%p621_p11)  ;;  %v826_v1 = vmov (!%p621_p11), 0.0  }
  0x3e   : > { %s1176_s13 = smov (!%p282_p10, %s615_s13), 23  ;;  %299 = sbr.rel (%p621_p11) target bundleno = 69 (0x45), region = 44 }
  0x3f   : > { %s632_s15 = sshll.u32 %s1176_s13, 4  ;;  %vm302_vm0 = vcmp.lt.s32.totalorder (!%p621_p11), %v300_v0, 256 }
  0x40   : > { %s984_s27 = scalar_lea.vmem %s1153_s2, %s632_s15  ;;  %s989_s9 = scalar_lea.vmem %s1154_s3, %s632_s15  ;;  %304 = vst.msk [vmem:[#allocation7] sm:$0x3] (!%p621_p11), %vm302_vm0, %v826_v1 }
  0x45 PF: > { %s994_s30 = sld [smem:[#allocation2]]  ;;  %v306_v2 = vld [vmem:[%s984_s27] sm:$0xff]  ;;  %v307_v5 = vld [vmem:[%s984_s27 + $0x8] sm:$0xff]  ;;  %v308_v8 = vld [vmem:[%s984_s27 + $0x10] sm:$0xff]  ;;  %s635_s12 = sshll.u32 %s886_s0, 11 }
  0x46   : > { %v389_v3 = vld [vmem:[%s989_s9] sm:$0xff]  ;;  %v390_v6 = vld [vmem:[%s989_s9 + $0x8] sm:$0xff]  ;;  %v391_v9 = vld [vmem:[%s989_s9 + $0x10] sm:$0xff]  ;;  %s486_s14 = sshll.u32 %s991_s10, 4  ;;  %s1081_s13 = scalar_lea.hbm %s1155_s4, %s635_s12  ;;  %s1083_s14 = int_to_ptr.vmem [resolvable:$true] %s486_s14 }
  0x47   : > { %v405_v4 = vmul.f32 %v389_v3, %v306_v2  ;;  %v406_v7 = vmul.f32 %v390_v6, %v307_v5  ;;  %v407_v10 = vmul.f32 %v391_v9, %v308_v8  ;;  %v309_v11 = vld [vmem:[%s984_s27 + $0x18] sm:$0xff]  ;;  %v310_v14 = vld [vmem:[%s984_s27 + $0x20] sm:$0xff]  ;;  %v311_v18 = vld [vmem:[%s984_s27 + $0x28] sm:$0xff]  ;;  %s725_s15 = scalar_lea.vmem %s1083_s14, 2048  ;;  %p1164_p12 = scmp.ne.s32.totalorder %s1161_s6, 0 }
  0x48   : > { %v392_v12 = vld [vmem:[%s989_s9 + $0x18] sm:$0xff]  ;;  %v393_v15 = vld [vmem:[%s989_s9 + $0x20] sm:$0xff]  ;;  %v394_v19 = vld [vmem:[%s989_s9 + $0x28] sm:$0xff]  ;;  %p726_p6 = scmp.ne.s32.totalorder %s1083_s14, %s725_s15  ;;  %s827_s16 = smov [#allocation6]  }
  0x49   : > { %v408_v13 = vmul.f32 %v392_v12, %v309_v11  ;;  %v421_v16 = vadd.f32 %v407_v10, %v405_v4  ;;  %v409_v17 = vmul.f32 %v393_v15, %v310_v14  ;;  %v322_v20 = vld [vmem:[%s974_s26] sm:$0xff]  ;;  %v410_v22 = vmul.f32 %v394_v19, %v311_v18  ;;  %v312_v23 = vld [vmem:[%s984_s27 + $0x30] sm:$0xff]  ;;  %v323_v25 = vld [vmem:[%s974_s26 + $0x8] sm:$0xff]  ;;  %s729_s17 = sshll.u32 %s827_s16, 4  ;;  %s730_s17 = int_to_ptr.vmem [resolvable:$false] %s729_s17 }
  0x4a   : > { %v395_v24 = vld [vmem:[%s989_s9 + $0x30] sm:$0xff]  ;;  %v313_v28 = vld [vmem:[%s984_s27 + $0x38] sm:$0xff]  ;;  %v326_v33 = vld [vmem:[%s974_s26 + $0x20] sm:$0xff]  ;;  %p727_p8 = pnand %p726_p6, %p1164_p12  ;;  %p732_p13 = scmp.lt.s32.totalorder %s1083_s14, %s730_s17 }
  0x4b   : > { %s338_s11 = smul.f32 0.01, %s994_s30  ;;  %v434_v21 = vadd.f32 %v408_v13, %v406_v7  ;;  %v422_v26 = vadd.f32 %v421_v16, %v409_v17  ;;  %v411_v27 = vmul.f32 %v395_v24, %v312_v23  ;;  %v396_v29 = vld [vmem:[%s989_s9 + $0x38] sm:$0xff]  ;;  %v324_v31 = vld [vmem:[%s974_s26 + $0x10] sm:$0xff]  ;;  %v327_v40 = vld [vmem:[%s974_s26 + $0x28] sm:$0xff] }
  0x4c   : > { %v325_v32 = vld [vmem:[%s974_s26 + $0x18] sm:$0xff]  ;;  %v412_v35 = vmul.f32 %v396_v29, %v313_v28  ;;  %v328_v41 = vld [vmem:[%s974_s26 + $0x30] sm:$0xff]  ;;  %v314_v47 = vld [vmem:[%s984_s27 + $0x40] sm:$0xff]  ;;  %p728_p9 = pneg %p727_p8 }
  0x4d   : > { %v1015_v30 = vstv %s338_s11  ;;  %v435_v34 = vadd.f32 %v434_v21, %v410_v22  ;;  %v329_v42 = vld [vmem:[%s974_s26 + $0x38] sm:$0xff]  ;;  %v423_v46 = vadd.f32 %v422_v26, %v411_v27  ;;  %v397_v48 = vld [vmem:[%s989_s9 + $0x40] sm:$0xff]  ;;  %v315_v49 = vld [vmem:[%s984_s27 + $0x48] sm:$0xff] }
  0x4e   : > { %v340_v36 = vmul.f32 %v1015_v30, %v306_v2  ;;  %v341_v37 = vmul.f32 %v1015_v30, %v307_v5  ;;  %v342_v38 = vmul.f32 %v1015_v30, %v308_v8  ;;  %v343_v39 = vmul.f32 %v1015_v30, %v309_v11  ;;  %v398_v54 = vld [vmem:[%s989_s9 + $0x48] sm:$0xff]  ;;  %v316_v55 = vld [vmem:[%s984_s27 + $0x50] sm:$0xff]  ;;  %v330_v61 = vld [vmem:[%s974_s26 + $0x40] sm:$0xff] }
  0x4f   : > { %v344_v43 = vmul.f32 %v1015_v30, %v310_v14  ;;  %v345_v44 = vmul.f32 %v1015_v30, %v311_v18  ;;  %v346_v45 = vmul.f32 %v1015_v30, %v312_v23  ;;  %v399_v56 = vld [vmem:[%s989_s9 + $0x50] sm:$0xff]  ;;  %v347_v60 = vmul.f32 %v1015_v30, %v313_v28  ;;  %v331_v62 = vld [vmem:[%s974_s26 + $0x48] sm:$0xff]  ;;  %v317_v4 = vld [vmem:[%s984_s27 + $0x58] sm:$0xff] }
  0x50   : > { %v356_v50 = vsub.f32 %v322_v20, %v340_v36  ;;  %v357_v51 = vsub.f32 %v323_v25, %v341_v37  ;;  %v358_v52 = vsub.f32 %v324_v31, %v342_v38  ;;  %v359_v53 = vsub.f32 %v325_v32, %v343_v39  ;;  %v332_v3 = vld [vmem:[%s974_s26 + $0x50] sm:$0xff]  ;;  %v400_v5 = vld [vmem:[%s989_s9 + $0x58] sm:$0xff]  ;;  %v318_v11 = vld [vmem:[%s984_s27 + $0x60] sm:$0xff] }
  0x51   : > { %v360_v57 = vsub.f32 %v326_v33, %v344_v43  ;;  %v361_v58 = vsub.f32 %v327_v40, %v345_v44  ;;  %v362_v59 = vsub.f32 %v328_v41, %v346_v45  ;;  %v436_v63 = vadd.f32 %v435_v34, %v412_v35  ;;  %v333_v10 = vld [vmem:[%s974_s26 + $0x58] sm:$0xff]  ;;  %v401_v12 = vld [vmem:[%s989_s9 + $0x60] sm:$0xff]  ;;  %v319_v18 = vld [vmem:[%s984_s27 + $0x68] sm:$0xff] }
  0x52   : > { %372 = vst [vmem:[%s991_s10] sm:$0xff] %v356_v50  ;;  %373 = vst [vmem:[%s991_s10 + $0x8] sm:$0xff] %v357_v51  ;;  %v348_v0 = vmul.f32 %v1015_v30, %v314_v47  ;;  %v413_v1 = vmul.f32 %v397_v48, %v314_v47  ;;  %v349_v2 = vmul.f32 %v1015_v30, %v315_v49  ;;  %v334_v17 = vld [vmem:[%s974_s26 + $0x60] sm:$0xff]  ;;  %v402_v19 = vld [vmem:[%s989_s9 + $0x68] sm:$0xff] }
  0x53   : > { %374 = vst [vmem:[%s991_s10 + $0x10] sm:$0xff] %v358_v52  ;;  %375 = vst [vmem:[%s991_s10 + $0x18] sm:$0xff] %v359_v53  ;;  %v363_v6 = vsub.f32 %v329_v42, %v347_v60  ;;  %v414_v7 = vmul.f32 %v398_v54, %v315_v49  ;;  %v350_v8 = vmul.f32 %v1015_v30, %v316_v55  ;;  %v335_v24 = vld [vmem:[%s974_s26 + $0x68] sm:$0xff]  ;;  %v320_v25 = vld [vmem:[%s984_s27 + $0x70] sm:$0xff] }
  0x54   : > { %376 = vst [vmem:[%s991_s10 + $0x20] sm:$0xff] %v360_v57  ;;  %377 = vst [vmem:[%s991_s10 + $0x28] sm:$0xff] %v361_v58  ;;  %v415_v9 = vmul.f32 %v399_v56, %v316_v55  ;;  %v364_v13 = vsub.f32 %v330_v61, %v348_v0  ;;  %v424_v14 = vadd.f32 %v423_v46, %v413_v1  ;;  %v403_v26 = vld [vmem:[%s989_s9 + $0x70] sm:$0xff]  ;;  %v321_v33 = vld [vmem:[%s984_s27 + $0x78] sm:$0xff]  ;;  %s731_s27 = scalar_lea.vmem %s730_s17, 4096 }
  0x55   : > { %378 = vst [vmem:[%s991_s10 + $0x30] sm:$0xff] %v362_v59  ;;  %v365_v15 = vsub.f32 %v331_v62, %v349_v2  ;;  %v351_v16 = vmul.f32 %v1015_v30, %v317_v4  ;;  %379 = vst [vmem:[%s991_s10 + $0x38] sm:$0xff] %v363_v6  ;;  %v437_v20 = vadd.f32 %v436_v63, %v414_v7  ;;  %v336_v32 = vld [vmem:[%s974_s26 + $0x70] sm:$0xff]  ;;  %v404_v34 = vld [vmem:[%s989_s9 + $0x78] sm:$0xff]  ;;  %p733_p1 = scmp.lt.s32.totalorder %s731_s27, %s725_s15 }
  0x56   : > { %v366_v21 = vsub.f32 %v332_v3, %v350_v8  ;;  %v416_v22 = vmul.f32 %v400_v5, %v317_v4  ;;  %v352_v23 = vmul.f32 %v1015_v30, %v318_v11  ;;  %380 = vst [vmem:[%s991_s10 + $0x40] sm:$0xff] %v364_v13  ;;  %v425_v27 = vadd.f32 %v424_v14, %v415_v9  ;;  %v337_v39 = vld [vmem:[%s974_s26 + $0x78] sm:$0xff]  ;;  %s472_s26 = scalar_lea.sflag [#allocation5], %s970_s18 }
  0x57   : > { %381 = vst [vmem:[%s991_s10 + $0x48] sm:$0xff] %v365_v15  ;;  %v367_v28 = vsub.f32 %v333_v10, %v351_v16  ;;  %v417_v29 = vmul.f32 %v401_v12, %v318_v11  ;;  %v353_v31 = vmul.f32 %v1015_v30, %v319_v18  ;;  %v418_v37 = vmul.f32 %v402_v19, %v319_v18  ;;  %p734_p3 = por %p733_p1, %p732_p13 }
  0x58   : > { %382 = vst [vmem:[%s991_s10 + $0x50] sm:$0xff] %v366_v21  ;;  %v438_v35 = vadd.f32 %v437_v20, %v416_v22  ;;  %v368_v36 = vsub.f32 %v334_v17, %v352_v23  ;;  %v354_v38 = vmul.f32 %v1015_v30, %v320_v25  ;;  %v419_v42 = vmul.f32 %v403_v26, %v320_v25 }
  0x59   : > { %383 = vst [vmem:[%s991_s10 + $0x58] sm:$0xff] %v367_v28  ;;  %v426_v40 = vadd.f32 %v425_v27, %v417_v29  ;;  %v369_v41 = vsub.f32 %v335_v24, %v353_v31  ;;  %v355_v43 = vmul.f32 %v1015_v30, %v321_v33  ;;  %v420_v46 = vmul.f32 %v404_v34, %v321_v33  ;;  %p735_p4 = pnand %p734_p3, %p728_p9 }
  0x5a   : > { %384 = vst [vmem:[%s991_s10 + $0x60] sm:$0xff] %v368_v36  ;;  %v439_v44 = vadd.f32 %v438_v35, %v418_v37  ;;  %v370_v45 = vsub.f32 %v336_v32, %v354_v38 }
  0x5b   : > { %385 = vst [vmem:[%s991_s10 + $0x68] sm:$0xff] %v369_v41  ;;  %v427_v47 = vadd.f32 %v426_v40, %v419_v42  ;;  %v371_v48 = vsub.f32 %v337_v39, %v355_v43 }
  0x5c   : > { %386 = vst [vmem:[%s991_s10 + $0x70] sm:$0xff] %v370_v45  ;;  %v440_v30 = vadd.f32 %v439_v44, %v420_v46 }
  0x5d   : > { %v428_v49 = vrot.slane %v427_v47, 4  ;;  %387 = vst [vmem:[%s991_s10 + $0x78] sm:$0xff] %v371_v48 }
  0x5e   : > { %v441_v50 = vrot.slane %v440_v30, 4 }
  0x5f   : > { %738 = shalt.err (!%p735_p4)
}
  0x60   : > { %s739_s29 = scalar_lea.hbm %s1081_s13, 2048  ;;  %s743_s10 = scalar_lea.hbm %s1155_s4, 6144 }
  0x61   : > { %p740_p5 = scmp.ne.s32.totalorder %s1081_s13, %s739_s29  ;;  %p744_p2 = scmp.lt.u32.totalorder %s1081_s13, %s1155_s4 }
  0x62   : > { %p745_p10 = scmp.lt.u32.totalorder %s743_s10, %s739_s29  ;;  %p747_p6 = scmp.lt.u32.totalorder %s739_s29, %s1081_s13 }
  0x63   : > { %p741_p7 = pnand %p740_p5, %p1164_p12 }
  0x64   : > { %p746_p11 = por %p745_p10, %p744_p2 }
  0x65   : > { %p742_p0 = pneg %p741_p7 }
  0x66   : > { %p748_p8 = por %p747_p6, %p746_p11 }
  0x68   : > { %p749_p9 = pnand %p748_p8, %p742_p0 }
  0x6a   : > { %752 = shalt.err (!%p749_p9)
}
  0x6b   : > { %s828_s12 = smov 256   ;;  %s829_s19 = smov 16   ;;  %v429_v51 = vadd.f32 %v428_v49, %v427_v47  ;;  %v442_v52 = vadd.f32 %v441_v50, %v440_v30  ;;  %v830_v53 = vmov 1966171168   ;;  %v453_v55 = vlaneseq  ;;  %v388_v5 = vld [vmem:[#allocation7] sm:$0x3] }
  0x6c   : > { %638 = dma.vmem_to_hbm [thread:$0]  (%p1164_p12), %s1083_s14, 2048, %s1081_s13, %s472_s26, %s828_s12, %s828_s12, %s829_s19   ;;  %v451_v54 = vunpack.c.l.s4 %v830_v53 }
  0x6d   : > { %v430_v56 = vrot.slane %v429_v51, 2  ;;  %v443_v57 = vrot.slane %v442_v52, 2  ;;  %v454_v61 = vshrl.u32 %v453_v55, 7  ;;  %s831_s6 = smov [#allocation7]   ;;  %vm468_vm1 = vcmp.lt.s32.totalorder %v453_v55, 256  ;;  %p1165_p13 = scmp.eq.s32.totalorder %s886_s0, 2 }
  0x6e   : > { %v452_v60 = vunpack.c.0.s8 %v451_v54  ;;  %s500_s18 = sshll.u32 %s831_s6, 4  ;;  %s501_s18 = int_to_ptr.vmem [resolvable:$true] %s500_s18 }
  0x6f   : > { %v431_v58 = vadd.f32 %v430_v56, %v429_v51  ;;  %v444_v59 = vadd.f32 %v443_v57, %v442_v52  ;;  %s753_s14 = scalar_lea.vmem %s501_s18, 32  ;;  %p760_p4 = scmp.lt.s32.totalorder %s501_s18, %s501_s18 }
  0x70   : > { %v455_v2 = vsub.s32 %v452_v60, %v454_v61  ;;  %p754_p12 = scmp.ne.s32.totalorder %s501_s18, %s753_s14  ;;  %p761_p5 = scmp.lt.s32.totalorder %s753_s14, %s753_s14 }
  0x71   : > { %v432_v62 = vrot.slane %v431_v58, 1  ;;  %v445_v63 = vrot.slane %v444_v59, 1 }
  0x72   : > { %p755_p1 = pnand %p754_p12, %p1165_p13  ;;  %p762_p7 = por %p761_p5, %p760_p4 }
  0x73   : > { %v433_v0 = vadd.f32 %v432_v62, %v431_v58  ;;  %v446_v1 = vadd.f32 %v445_v63, %v444_v59 }
  0x74   : > { %p756_p3 = pneg %p755_p1 }
  0x75   : > { %v449_v3 = vcombine.low %v433_v0, %v446_v1 }
  0x76   : > { %p763_p0 = pnand %p762_p7, %p756_p3 }
  0x77   : > { %v456_v4 = vrot.slane %v449_v3, %v455_v2 }
  0x79   : > { %v463_v6 = vrot.slane %v456_v4, %v455_v2 }
  0x7b   : > { %v465_v7 = vadd.f32 %v463_v6, %v388_v5 }
  0x7d   : > { %470 = vst.msk [vmem:[#allocation7] sm:$0x3] %vm468_vm1, %v465_v7 }
  0x7e   : > { %766 = shalt.err (!%p763_p0)
}
  0x7f   : > { %s767_s26 = scalar_lea.hbm %s1156_s5, 32  ;;  %p1166_p10 = pmov %p1165_p13 }
  0x80   : > { %p768_p2 = scmp.ne.s32.totalorder %s1156_s5, %s767_s26  ;;  %p773_p8 = scmp.lt.u32.totalorder %s767_s26, %s1156_s5 }
  0x82   : > { %p769_p11 = pnand %p768_p2, %p1166_p10 }
  0x84   : > { %p770_p6 = pneg %p769_p11 }
  0x86   : > { %p775_p9 = pnand %p773_p8, %p770_p6 }
  0x88   : > { %778 = shalt.err (!%p775_p9)
}
  0x89   : > { %p1167_p12 = pmov %p1166_p10  ;;  %p1168_p13 = pmov %p1166_p10 }
  0x8b   : > { %640 = dma.vmem_to_hbm [thread:$0]  (%p1167_p12), %s501_s18, 32, %s1156_s5, [#allocation8]  }
  0x8c   : > { %800 = dma.done.wait (%p1168_p13), [#allocation8], 32   ;;  %p1169_p1 = pmov %p1166_p10 }
  0x8e   : > { %802 = vsyncadd (%p1169_p1), [#allocation8], 4294967264 }
  0x8f PF: > { %p655_p3 = scmp.ge.s32.totalorder %s821_s23, 2  ;;  %s516_s9 = sand.u32 1, %s809_s20  }
  0x90   : > { %p1170_p4 = scmp.ne.s32.totalorder %s1162_s7, 0  ;;  %s517_s10 = scalar_lea.sflag [#allocation5], %s516_s9 }
  0x92   : > { %p649_p5 = pnand %p655_p3, %p1170_p4 }
  0x94   : > { %804 = dma.done.wait (!%p649_p5), %s517_s10, 2048  }
  0x95   : > { %806 = vsyncadd (!%p649_p5), %s517_s10, 4294965248  ;;  %p21_p7 = scmp.ge.s32.totalorder %s890_s25, 5   ;;  %s1171_s20 = smov %s813_s21 }
  0x96   : > { %s1172_s21 = smov %s817_s22  ;;  %s1173_s22 = smov %s902_s28 }
  0x97   : > { %s1174_s23 = smov %s890_s25  ;;  %23 = sbr.rel (!%p21_p7) target bundleno = 8 (0x8), region = 99 }
  0x9e   :  { %522 = vsyncpa [#allocation4], 1 }
  0x9f   :  { %524 = vsyncpa [#allocation4 + $0x1], 1 }
  0xa0   :  { %525 = vsyncpa [#allocation5], 1 }
  0xa1   :  { %527 = vsyncpa [#allocation5 + $0x1], 1 }
  0xa2   :  { %528 = vsyncpa [#allocation8], 1 }

</bundles_post_ra>
